<compile_context>
chip_gen: v5e
topology: v5e:2x2
jax: 0.10.0
libtpu: 0.0.40
codegen_flags: <defaults>
</compile_context>

<pallas_src>
import jax
import jax.numpy as jnp
from jax.experimental import pallas as pl
from jax.experimental.pallas import tpu as pltpu


def _round_up(x, m):
    return ((x + m - 1) // m) * m


def readout_kernel(x_ref, m_ref, inv_ref, w_ref, b_ref, e_ref, wm_ref, bm_ref,
                   o_ref):
    gd = e_ref.shape[1]                     # G * D (lane-packed feature width)

    # One packed MXU matmul per step:
    #   x_packed (rows, G*D) @ [blockdiag(We) | blockdiag(wa)] -> (rows, G*D+G)
    z = jnp.dot(x_ref[...], w_ref[...],
                preferred_element_type=jnp.float32)

    # Split adds so the VPU never touches the lane-padded tail of z.
    emb = jnp.maximum(z[:, :gd] + b_ref[:, :gd], 0.0)        # (rows, G*D) dense
    att = jax.nn.sigmoid(z[:, gd:] + b_ref[:, gd:])          # (rows, G) narrow

    # mask*att computed narrow, expanded to (rows, G*D) on the (idle) MXU with
    # an exact 0/1 selection matrix.  hm = mask*att*relu(...) >= 0, so
    # max_n(hm) == max_n(h + (mask-1)*1e9) exactly whenever a graph has >= 1
    # valid node (the only case the reference itself supports).
    am = jnp.dot(att * m_ref[...], e_ref[...],
                 preferred_element_type=jnp.float32)          # (rows, G*D)
    hm = emb * am                                             # masked att*emb

    rb = inv_ref.shape[0]                                     # graphs/step / G
    hm3 = hm.reshape(rb, hm.shape[0] // rb, gd)               # free: Np % 8 == 0
    pooled = jnp.max(hm3, axis=1) + jnp.sum(hm3, axis=1) * inv_ref[...]

    # Batched final GEMM with block-diagonal Wm: (rb, G*D) @ (G*D, G*out).
    out = jnp.dot(pooled.astype(wm_ref.dtype), wm_ref[...],
                  preferred_element_type=jnp.float32) + bm_ref[...]
    o_ref[...] = out.astype(o_ref.dtype)


def readout_layer(x, mask, wa, ba, we, be, wm, bm, *,
                  matmul_dtype=jnp.bfloat16, max_graphs_per_step=None):
    """Pallas ReadoutLayer forward.

    x: (B, N, D), mask: (B, N, 1), wa: (D, 1), ba: (1, 1), we: (D, D),
    be: (1, D), wm: (D, out_dim), bm: (1, out_dim).
    matmul_dtype: MXU operand dtype; bf16 recommended on v5e/v6e/v7x
    (f32 accumulation is always used).
    """
    B, N, D = x.shape
    out_dim = wm.shape[1]
    f32 = jnp.float32

    # Lane packing factor: G graphs side by side on the 128-lane axis.
    G = 128 // D if (D <= 128 and 128 % D == 0) else 1
    Np = _round_up(N, 8)                 # keeps the in-kernel reshape layout-free
    tb_unit = 8 * G                      # graphs/step so row blocks stay 8-aligned
    isz = jnp.dtype(matmul_dtype).itemsize

    # ---- generation-aware VMEM budget -> graphs per grid step (tb) ----------
    try:
        vmem_phys = getattr(pltpu.get_tpu_info(), "vmem_capacity_bytes", None) \
            or (64 << 20)
    except Exception:                    # interpret mode / CPU AOT etc.
        vmem_phys = 64 << 20
    # ~46 MiB on v7x (64 MiB physical), ~92 MiB on v5e/v6e (128 MiB physical).
    budget = int(vmem_phys * 0.72)

    per_graph = (Np * D * isz * 2                    # x block (double-buffered)
                 + Np * 4 * 2                        # packed mask block
                 + D * 4 * 2                         # 1/count row
                 + out_dim * 4 * 2                   # output block
                 + 3 * Np * (D + 1) * 4)             # f32 z / emb / hm temporaries
    wgt_bytes = ((G * D) * (G * D + G) + (G * D) * (G * out_dim)) * isz \
                + (2 * (G * D + G) + G * out_dim) * 4
    tb_vmem = max(0, budget - 2 * wgt_bytes - (2 << 20)) // max(per_graph, 1)
    tb_vmem = max(tb_unit, (tb_vmem // tb_unit) * tb_unit)
    # Keep grid length >= 2 when B allows so both v7x TensorCores get work.
    tb_two = _round_up(max(1, pl.cdiv(B, 2)), tb_unit)
    tb = max(tb_unit, min(tb_vmem, tb_two))
    if max_graphs_per_step is not None:
        tb = max(tb_unit, min(tb, _round_up(max_graphs_per_step, tb_unit)))

    bp = _round_up(B, tb)
    steps = bp // tb
    rb = tb // G                          # graph-groups (rows of pooled) per step

    # ---- wrapper-side packing ------------------------------------------------
    x_p = x.astype(matmul_dtype)
    m_p = mask.astype(f32)
    if bp != B or Np != N:
        # Padded graphs/nodes get mask = 0; their h*mask is 0 everywhere and the
        # padded rows are sliced off below (no 0/0 thanks to max(count, 1)).
        x_p = jnp.pad(x_p, ((0, bp - B), (0, Np - N), (0, 0)))
        m_p = jnp.pad(m_p, ((0, bp - B), (0, Np - N), (0, 0)))

    count = jnp.sum(m_p, axis=1)                               # (bp, 1)
    inv = 1.0 / jnp.maximum(count, 1.0)                        # per-graph 1/count
    inv_b = jnp.broadcast_to(inv.reshape(bp // G, G, 1),
                             (bp // G, G, D)).reshape(bp // G, G * D)

    x_packed = x_p.reshape(bp // G, G, Np, D).transpose(0, 2, 1, 3) \
                  .reshape(bp // G * Np, G * D)
    m_packed = m_p.reshape(bp // G, G, Np).transpose(0, 2, 1) \
                  .reshape(bp // G * Np, G)

    eye_g = jnp.eye(G, dtype=f32)
    w_big = jnp.concatenate([jnp.kron(eye_g, we), jnp.kron(eye_g, wa)],
                            axis=1).astype(matmul_dtype)       # (G*D, G*D+G)
    b_row = jnp.concatenate([jnp.tile(be, (1, G)), jnp.tile(ba, (1, G))],
                            axis=1).astype(f32)                # (1, G*D+G)
    e_mat = jnp.kron(eye_g, jnp.ones((1, D), f32))             # (G, G*D), 0/1 exact
    wm_big = jnp.kron(eye_g, wm).astype(matmul_dtype)          # (G*D, G*out)
    bm_row = jnp.tile(bm, (1, G)).astype(f32)                  # (1, G*out)

    gd, gw = G * D, G * D + G
    rows = (bp // G) * Np
    cost = pl.CostEstimate(
        flops=(2 * rows * gd * gw                    # packed emb+att matmul
               + 2 * rows * G * gd                   # mask*att lane expansion
               + 2 * (bp // G) * gd * (G * out_dim)),
        transcendentals=2 * bp * Np,                 # sigmoid ~= exp + reciprocal
        bytes_accessed=(rows * gd * isz + rows * G * 4 + (bp // G) * gd * 4
                        + gd * gw * isz + gd * G * out_dim * isz
                        + (gw + G * gd + G * out_dim) * 4
                        + (bp // G) * G * out_dim * 4))

    out_packed = pl.pallas_call(
        readout_kernel,
        out_shape=jax.ShapeDtypeStruct((bp // G, G * out_dim), jnp.float32),
        grid_spec=pltpu.PrefetchScalarGridSpec(
            num_scalar_prefetch=0,
            grid=(steps,),
            in_specs=[
                pl.BlockSpec((rb * Np, gd), lambda b: (b, 0)),      # x (lane-packed)
                pl.BlockSpec((rb * Np, G), lambda b: (b, 0)),       # mask (packed)
                pl.BlockSpec((rb, gd), lambda b: (b, 0)),           # 1/count
                # Constant operands below are revisited every step; at D=32 the
                # double-buffered footprint is < 100 KB, so we deliberately skip
                # pipeline_mode=pl.Buffered(1) (only worth it for large D).
                pl.BlockSpec((gd, gw), lambda b: (0, 0)),           # [bdiag(We)|bdiag(wa)]
                pl.BlockSpec((1, gw), lambda b: (0, 0)),            # [be x G | ba x G]
                pl.BlockSpec((G, gd), lambda b: (0, 0)),            # 0/1 expansion
                pl.BlockSpec((gd, G * out_dim), lambda b: (0, 0)),  # bdiag(Wm)
                pl.BlockSpec((1, G * out_dim), lambda b: (0, 0)),   # bm x G
            ],
            out_specs=pl.BlockSpec((rb, G * out_dim), lambda b: (b, 0)),
        ),
        compiler_params=pltpu.CompilerParams(
            dimension_semantics=("parallel",),       # megacore-shardable on v7x
            vmem_limit_bytes=int(budget)),
        cost_estimate=cost,
    )(x_packed, m_packed, inv_b, w_big, b_row, e_mat, wm_big, bm_row)

    return out_packed.reshape(bp, out_dim)[:B]


def xavier_uniform(key, fan_in, fan_out):
    # matches torch.nn.init.xavier_uniform_ with gain=1, stored as (in, out)
    bound = jnp.sqrt(6.0 / (fan_in + fan_out))
    return jax.random.uniform(key, (fan_in, fan_out),
                              minval=-bound, maxval=bound, dtype=jnp.float32)


def reference(x, mask, wa, ba, we, be, wm, bm, matmul_dtype=jnp.float32):
    # Direct translation of the PyTorch forward (dropout = identity).  With a
    # reduced-precision matmul_dtype it emulates the kernel's MXU operand dtype
    # while keeping f32 accumulation and f32 elementwise math.
    xc = x.astype(matmul_dtype)
    att = jax.nn.sigmoid(
        jnp.dot(xc, wa.astype(matmul_dtype),
                preferred_element_type=jnp.float32) + ba)
    emb = jnp.maximum(
        jnp.dot(xc, we.astype(matmul_dtype),
                preferred_element_type=jnp.float32) + be, 0.0)
    h = att * emb
    mx = jnp.max(h + (mask - 1.0) * 1e9, axis=1)
    mean = jnp.sum(h * mask, axis=1) / jnp.sum(mask, axis=1)
    pooled = mx + mean
    return jnp.dot(pooled.astype(matmul_dtype), wm.astype(matmul_dtype),
                   preferred_element_type=jnp.float32) + bm


if __name__ == "__main__":
    key = jax.random.PRNGKey(0)
    N, D, OUT = 8, 32, 16

    k_wa, k_we, k_wm, k_x1, k_m1, k_x2, k_m2 = jax.random.split(key, 7)

    # deterministic xavier-uniform weights, zero biases (as in reset_parameters)
    wa = xavier_uniform(k_wa, D, 1)                      # att: Linear(D -> 1)
    ba = jnp.zeros((1, 1), dtype=jnp.float32)
    we = xavier_uniform(k_we, D, D)                      # emb: Linear(D -> D)
    be = jnp.zeros((1, D), dtype=jnp.float32)
    wm = xavier_uniform(k_wm, D, OUT)                    # mlp: Linear(D -> OUT)
    bm = jnp.zeros((1, OUT), dtype=jnp.float32)

    def make_inputs(kx, km, batch):
        xx = jax.random.normal(kx, (batch, N, D), dtype=jnp.float32)
        mm = (jax.random.uniform(km, (batch, N, 1)) > 0.3).astype(jnp.float32)
        mm = mm.at[:, 0, :].set(1.0)        # at least one valid node per graph
        return xx, mm

    # Run 1: B=16 (single grid step, batch padding 16 -> 32 exercised).
    x1, m1 = make_inputs(k_x1, k_m1, 16)
    out1 = jax.block_until_ready(
        readout_layer(x1, m1, wa, ba, we, be, wm, bm))
    ref1 = reference(x1, m1, wa, ba, we, be, wm, bm, matmul_dtype=jnp.bfloat16)
    assert out1.shape == (16, OUT)
    assert jnp.allclose(out1, ref1, atol=3e-3, rtol=3e-3), (
        f"run1 mismatch: max abs err {jnp.max(jnp.abs(out1 - ref1))}")

    # Run 2: B=40 -> 2 grid steps (exercises the batch-blocked index maps and
    # uneven-batch padding / slicing).
    x2, m2 = make_inputs(k_x2, k_m2, 40)
    out2 = jax.block_until_ready(
        readout_layer(x2, m2, wa, ba, we, be, wm, bm, max_graphs_per_step=32))
    ref2 = reference(x2, m2, wa, ba, we, be, wm, bm, matmul_dtype=jnp.bfloat16)
    assert out2.shape == (40, OUT)
    assert jnp.allclose(out2, ref2, atol=3e-3, rtol=3e-3), (
        f"run2 mismatch: max abs err {jnp.max(jnp.abs(out2 - ref2))}")

    print("KERNEL_OK")
</pallas_src>

<mosaic_0001>
module attributes {stable_mosaic.version = 11 : i64} {
  func.func @readout_kernel(%arg0: i32, %arg1: memref<64x128xbf16, #tpu.memory_space<vmem>>, %arg2: memref<64x4xf32, #tpu.memory_space<vmem>>, %arg3: memref<8x128xf32, #tpu.memory_space<vmem>>, %arg4: memref<128x132xbf16, #tpu.memory_space<vmem>>, %arg5: memref<1x132xf32, #tpu.memory_space<vmem>>, %arg6: memref<4x128xf32, #tpu.memory_space<vmem>>, %arg7: memref<128x64xbf16, #tpu.memory_space<vmem>>, %arg8: memref<1x64xf32, #tpu.memory_space<vmem>>, %arg9: memref<8x64xf32, #tpu.memory_space<vmem>>) attributes {dimension_semantics = [#tpu.dimension_semantics<parallel>], iteration_bounds = array<i64: 1>, scalar_prefetch = 0 : i64, scratch_operands = 0 : i64, tpu.core_type = #tpu.core_type<tc>, window_params = [{transform_indices = @transform_0, window_bounds = array<i64: 64, 128>}, {transform_indices = @transform_1, window_bounds = array<i64: 64, 4>}, {transform_indices = @transform_2, window_bounds = array<i64: 8, 128>}, {pipeline_mode = #tpu.pipeline_mode<synchronous>, transform_indices = @transform_3, window_bounds = array<i64: 128, 132>}, {pipeline_mode = #tpu.pipeline_mode<synchronous>, transform_indices = @transform_4, window_bounds = array<i64: 1, 132>}, {pipeline_mode = #tpu.pipeline_mode<synchronous>, transform_indices = @transform_5, window_bounds = array<i64: 4, 128>}, {pipeline_mode = #tpu.pipeline_mode<synchronous>, transform_indices = @transform_6, window_bounds = array<i64: 128, 64>}, {pipeline_mode = #tpu.pipeline_mode<synchronous>, transform_indices = @transform_7, window_bounds = array<i64: 1, 64>}, {transform_indices = @transform_8, window_bounds = array<i64: 8, 64>}]} {
    %c0 = arith.constant 0 : index
    %c0_0 = arith.constant 0 : index
    %0 = vector.load %arg1[%c0, %c0_0] : memref<64x128xbf16, #tpu.memory_space<vmem>>, vector<64x128xbf16>
    %c0_1 = arith.constant 0 : index
    %c0_2 = arith.constant 0 : index
    %1 = vector.load %arg4[%c0_1, %c0_2] : memref<128x132xbf16, #tpu.memory_space<vmem>>, vector<128x132xbf16>
    %cst = arith.constant dense<0.000000e+00> : vector<64x132xf32>
    %2 = tpu.matmul %0, %1, %cst {dimension_numbers = #tpu.dot_dimension_numbers<[1], [0], [0], [1], [0, 0, 1, 1], [], []>} : vector<64x128xbf16>, vector<128x132xbf16>, vector<64x132xf32> -> vector<64x132xf32>
    %3 = vector.extract_strided_slice %2 {offsets = [0, 0], sizes = [64, 128], strides = [1, 1]} : vector<64x132xf32> to vector<64x128xf32>
    %c0_3 = arith.constant 0 : index
    %c0_4 = arith.constant 0 : index
    %4 = vector.load %arg5[%c0_3, %c0_4] : memref<1x132xf32, #tpu.memory_space<vmem>>, vector<1x128xf32>
    %5 = vector.broadcast %4 : vector<1x128xf32> to vector<64x128xf32>
    %6 = arith.addf %3, %5 : vector<64x128xf32>
    %cst_5 = arith.constant 0.000000e+00 : f32
    %7 = vector.broadcast %cst_5 : f32 to vector<64x128xf32>
    %8 = arith.maximumf %6, %7 : vector<64x128xf32>
    %9 = vector.extract_strided_slice %2 {offsets = [0, 128], sizes = [64, 4], strides = [1, 1]} : vector<64x132xf32> to vector<64x4xf32>
    %c0_6 = arith.constant 0 : index
    %c128 = arith.constant 128 : index
    %10 = vector.load %arg5[%c0_6, %c128] : memref<1x132xf32, #tpu.memory_space<vmem>>, vector<1x4xf32>
    %11 = vector.broadcast %10 : vector<1x4xf32> to vector<64x4xf32>
    %12 = arith.addf %9, %11 : vector<64x4xf32>
    %13 = arith.negf %12 : vector<64x4xf32>
    %14 = math.exp %13 : vector<64x4xf32>
    %cst_7 = arith.constant 1.000000e+00 : f32
    %15 = vector.broadcast %cst_7 : f32 to vector<64x4xf32>
    %16 = arith.addf %15, %14 : vector<64x4xf32>
    %17 = arith.divf %15, %16 : vector<64x4xf32>
    %c0_8 = arith.constant 0 : index
    %c0_9 = arith.constant 0 : index
    %18 = vector.load %arg2[%c0_8, %c0_9] : memref<64x4xf32, #tpu.memory_space<vmem>>, vector<64x4xf32>
    %19 = arith.mulf %17, %18 : vector<64x4xf32>
    %c0_10 = arith.constant 0 : index
    %c0_11 = arith.constant 0 : index
    %20 = vector.load %arg6[%c0_10, %c0_11] : memref<4x128xf32, #tpu.memory_space<vmem>>, vector<4x128xf32>
    %cst_12 = arith.constant dense<0.000000e+00> : vector<64x128xf32>
    %21 = tpu.matmul %19, %20, %cst_12 {dimension_numbers = #tpu.dot_dimension_numbers<[1], [0], [0], [1], [0, 0, 1, 1], [], []>} : vector<64x4xf32>, vector<4x128xf32>, vector<64x128xf32> -> vector<64x128xf32>
    %22 = arith.mulf %8, %21 : vector<64x128xf32>
    %23 = vector.shape_cast %22 : vector<64x128xf32> to vector<8x8x128xf32>
    %cst_13 = arith.constant dense<0xFF800000> : vector<8x128xf32>
    %24 = vector.multi_reduction <maximumf>, %23, %cst_13 [1] : vector<8x8x128xf32> to vector<8x128xf32>
    %cst_14 = arith.constant dense<0.000000e+00> : vector<8x128xf32>
    %25 = vector.multi_reduction <add>, %23, %cst_14 [1] : vector<8x8x128xf32> to vector<8x128xf32>
    %c0_15 = arith.constant 0 : index
    %c0_16 = arith.constant 0 : index
    %26 = vector.load %arg3[%c0_15, %c0_16] : memref<8x128xf32, #tpu.memory_space<vmem>>, vector<8x128xf32>
    %27 = arith.mulf %25, %26 : vector<8x128xf32>
    %28 = arith.addf %24, %27 : vector<8x128xf32>
    %29 = arith.truncf %28 : vector<8x128xf32> to vector<8x128xbf16>
    %c0_17 = arith.constant 0 : index
    %c0_18 = arith.constant 0 : index
    %30 = vector.load %arg7[%c0_17, %c0_18] : memref<128x64xbf16, #tpu.memory_space<vmem>>, vector<128x64xbf16>
    %cst_19 = arith.constant dense<0.000000e+00> : vector<8x64xf32>
    %31 = tpu.matmul %29, %30, %cst_19 {dimension_numbers = #tpu.dot_dimension_numbers<[1], [0], [0], [1], [0, 0, 1, 1], [], []>} : vector<8x128xbf16>, vector<128x64xbf16>, vector<8x64xf32> -> vector<8x64xf32>
    %c0_20 = arith.constant 0 : index
    %c0_21 = arith.constant 0 : index
    %32 = vector.load %arg8[%c0_20, %c0_21] : memref<1x64xf32, #tpu.memory_space<vmem>>, vector<1x64xf32>
    %33 = vector.broadcast %32 : vector<1x64xf32> to vector<8x64xf32>
    %34 = arith.addf %31, %33 : vector<8x64xf32>
    %c0_22 = arith.constant 0 : index
    %c0_23 = arith.constant 0 : index
    %35 = vector.load %arg9[%c0_22, %c0_23] : memref<8x64xf32, #tpu.memory_space<vmem>>, vector<8x64xf32>
    tpu.vector_store %arg9[%c0_22, %c0_23], %34 {strides = array<i32>} : memref<8x64xf32, #tpu.memory_space<vmem>>, vector<8x64xf32>,
    return
  }
  func.func @transform_0(%arg0: i32) -> (i32, i32) {
    %c0_i32 = arith.constant 0 : i32
    %c0_i32_0 = arith.constant 0 : i32
    return %arg0, %c0_i32 : i32, i32
  }
  func.func @transform_1(%arg0: i32) -> (i32, i32) {
    %c0_i32 = arith.constant 0 : i32
    %c0_i32_0 = arith.constant 0 : i32
    return %arg0, %c0_i32 : i32, i32
  }
  func.func @transform_2(%arg0: i32) -> (i32, i32) {
    %c0_i32 = arith.constant 0 : i32
    %c0_i32_0 = arith.constant 0 : i32
    return %arg0, %c0_i32 : i32, i32
  }
  func.func @transform_3(%arg0: i32) -> (i32, i32) {
    %c0_i32 = arith.constant 0 : i32
    %c0_i32_0 = arith.constant 0 : i32
    %c0_i32_1 = arith.constant 0 : i32
    return %c0_i32, %c0_i32_0 : i32, i32
  }
  func.func @transform_4(%arg0: i32) -> (i32, i32) {
    %c0_i32 = arith.constant 0 : i32
    %c0_i32_0 = arith.constant 0 : i32
    %c0_i32_1 = arith.constant 0 : i32
    return %c0_i32, %c0_i32_0 : i32, i32
  }
  func.func @transform_5(%arg0: i32) -> (i32, i32) {
    %c0_i32 = arith.constant 0 : i32
    %c0_i32_0 = arith.constant 0 : i32
    %c0_i32_1 = arith.constant 0 : i32
    return %c0_i32, %c0_i32_0 : i32, i32
  }
  func.func @transform_6(%arg0: i32) -> (i32, i32) {
    %c0_i32 = arith.constant 0 : i32
    %c0_i32_0 = arith.constant 0 : i32
    %c0_i32_1 = arith.constant 0 : i32
    return %c0_i32, %c0_i32_0 : i32, i32
  }
  func.func @transform_7(%arg0: i32) -> (i32, i32) {
    %c0_i32 = arith.constant 0 : i32
    %c0_i32_0 = arith.constant 0 : i32
    %c0_i32_1 = arith.constant 0 : i32
    return %c0_i32, %c0_i32_0 : i32, i32
  }
  func.func @transform_8(%arg0: i32) -> (i32, i32) {
    %c0_i32 = arith.constant 0 : i32
    %c0_i32_0 = arith.constant 0 : i32
    return %arg0, %c0_i32 : i32, i32
  }
}

</mosaic_0001>

<bundles_post_ra>
// kernel: tpu_custom_call.1
= control target key start
LH: loop header
LB: loop body
LE: loop exit
PB: predicated region body
PF: predicated region fallthrough
CT: control target
= control target key end

     0   :  { %s1261_s0 = inlined_call_operand.vmem [shape: bf16[64,128], index: 0, kind: input, shape index: {}]   ;;  %s1262_s1 = inlined_call_operand.vmem [shape: f32[64,4], index: 1, kind: input, shape index: {}]   ;;  %s1263_s2 = inlined_call_operand.vmem [shape: f32[8,128], index: 2, kind: input, shape index: {}]   ;;  %s1264_s3 = inlined_call_operand.vmem [shape: bf16[128,132], index: 3, kind: input, shape index: {}]   ;;  %s1265_s4 = inlined_call_operand.vmem [shape: f32[1,132], index: 4, kind: input, shape index: {}]   ;;  %s1266_s5 = inlined_call_operand.vmem [shape: f32[4,128], index: 5, kind: input, shape index: {}]   ;;  %s1267_s6 = inlined_call_operand.vmem [shape: bf16[128,64], index: 6, kind: input, shape index: {}]   ;;  %s1268_s7 = inlined_call_operand.vmem [shape: f32[1,64], index: 7, kind: input, shape index: {}]   ;;  %s1269_s8 = inlined_call_operand.hbm [shape: f32[8,64], index: 8, kind: output, shape index: {}]  }
   0x1   :  { %v917_v0 = vld [vmem:[%s1264_s3 + $0x74] sm:$0xf]  ;;  %v846_v1 = vld [vmem:[%s1264_s3 + $0x78] sm:$0xf0]  ;;  %v915_v2 = vld [vmem:[%s1264_s3 + $0x64] sm:$0xf] }
   0x2   :  { %v849_v3 = vor.u32 %v917_v0, %v846_v1  ;;  %v838_v4 = vld [vmem:[%s1264_s3 + $0x68] sm:$0xf0]  ;;  %v913_v6 = vld [vmem:[%s1264_s3 + $0x54] sm:$0xf]  ;;  %v830_v7 = vld [vmem:[%s1264_s3 + $0x58] sm:$0xf0] }
   0x3   :  { %v841_v5 = vor.u32 %v915_v2, %v838_v4  ;;  %v833_v8 = vor.u32 %v913_v6, %v830_v7 }
   0x4   :  { %187 = vmatpush.bf16.msra.mxu1 %v849_v3 }
   0x8   :  { %188 = vmatpush.bf16.msra.mxu1 %v841_v5 }
   0x9   :  { %13 = vsyncpa [#allocation3], 0  ;;  %v911_v9 = vld [vmem:[%s1264_s3 + $0x44] sm:$0xf]  ;;  %v822_v10 = vld [vmem:[%s1264_s3 + $0x48] sm:$0xf0] }
   0xa   :  { %v825_v11 = vor.u32 %v911_v9, %v822_v10  ;;  %v909_v12 = vld [vmem:[%s1264_s3 + $0x34] sm:$0xf]  ;;  %v814_v13 = vld [vmem:[%s1264_s3 + $0x38] sm:$0xf0]  ;;  %v907_v15 = vld [vmem:[%s1264_s3 + $0x24] sm:$0xf] }
   0xb   :  { %v817_v14 = vor.u32 %v909_v12, %v814_v13  ;;  %v806_v16 = vld [vmem:[%s1264_s3 + $0x28] sm:$0xf0]  ;;  %v905_v18 = vld [vmem:[%s1264_s3 + $0x14] sm:$0xf]  ;;  %v798_v19 = vld [vmem:[%s1264_s3 + $0x18] sm:$0xf0] }
   0xc   :  { %189 = vmatpush.bf16.msra.mxu1 %v833_v8  ;;  %v809_v17 = vor.u32 %v907_v15, %v806_v16  ;;  %v801_v20 = vor.u32 %v905_v18, %v798_v19  ;;  %v903_v21 = vld [vmem:[%s1264_s3 + $0x4] sm:$0xf]  ;;  %v790_v22 = vld [vmem:[%s1264_s3 + $0x8] sm:$0xf0]  ;;  %v844_v26 = vld [vmem:[%s1264_s3 + $0x70] sm:$0xf] }
   0xd   :  { %v793_v23 = vor.u32 %v903_v21, %v790_v22  ;;  %v899_v24 = vld [vmem:[%s1261_s0] sm:$0xff]  ;;  %v900_v25 = vld [vmem:[%s1261_s0 + $0x8] sm:$0xff]  ;;  %v918_v27 = vld [vmem:[%s1264_s3 + $0x74] sm:$0xf0]  ;;  %vm442_vm0 = vcmask 1043456   ;;  %vm417_vm5 = vcmask 31744  }
   0xe   :  { %v836_v28 = vld [vmem:[%s1264_s3 + $0x60] sm:$0xf]  ;;  %v845_v29 = vor.u32 %v918_v27, %v844_v26  ;;  %v916_v30 = vld [vmem:[%s1264_s3 + $0x64] sm:$0xf0]  ;;  %v1104_v32 = vld [vmem:[%s1261_s0 + $0x10] sm:$0xff]  ;;  %s989_s20 = smov [#allocation2]  }
   0xf   :  { %v837_v31 = vor.u32 %v916_v30, %v836_v28  ;;  %v1110_v33 = vld [vmem:[%s1261_s0 + $0x18] sm:$0xff]  ;;  %v828_v34 = vld [vmem:[%s1264_s3 + $0x50] sm:$0xf]  ;;  %v820_v37 = vld [vmem:[%s1264_s3 + $0x40] sm:$0xf]  ;;  %s759_s21 = sshll.u32 %s989_s20, 4  ;;  %s760_s21 = int_to_ptr.vmem [resolvable:$true] %s759_s21 }
  0x10   :  { %190 = vmatpush.bf16.msra.mxu1 %v825_v11  ;;  %158 = vmatpush.bf16.msra.mxu0 %v845_v29  ;;  %v914_v35 = vld [vmem:[%s1264_s3 + $0x54] sm:$0xf0]  ;;  %v912_v38 = vld [vmem:[%s1264_s3 + $0x44] sm:$0xf0]  ;;  %v812_v40 = vld [vmem:[%s1264_s3 + $0x30] sm:$0xf] }
  0x11   :  { %v829_v36 = vor.u32 %v914_v35, %v828_v34  ;;  %v821_v39 = vor.u32 %v912_v38, %v820_v37  ;;  %v910_v41 = vld [vmem:[%s1264_s3 + $0x34] sm:$0xf0]  ;;  %v804_v43 = vld [vmem:[%s1264_s3 + $0x20] sm:$0xf]  ;;  %v908_v44 = vld [vmem:[%s1264_s3 + $0x24] sm:$0xf0] }
  0x12   :  { %v813_v42 = vor.u32 %v910_v41, %v812_v40  ;;  %v805_v45 = vor.u32 %v908_v44, %v804_v43  ;;  %v796_v46 = vld [vmem:[%s1264_s3 + $0x10] sm:$0xf]  ;;  %v906_v47 = vld [vmem:[%s1264_s3 + $0x14] sm:$0xf0]  ;;  %v788_v49 = vld [vmem:[%s1264_s3] sm:$0xf] }
  0x13   :  { %v797_v48 = vor.u32 %v906_v47, %v796_v46  ;;  %v904_v50 = vld [vmem:[%s1264_s3 + $0x4] sm:$0xf0]  ;;  %v1152_v52 = vld [vmem:[%s1265_s4 + $0x1] ss:$0 sm:$0xff]  ;;  %s761_s24 = sshll.u32 %s1269_s8, 4  ;;  %s762_s24 = int_to_ptr.hbm [resolvable:$true] %s761_s24 }
  0x14   :  { %191 = vmatpush.bf16.msra.mxu1 %v817_v14  ;;  %159 = vmatpush.bf16.msra.mxu0 %v837_v31  ;;  %v789_v51 = vor.u32 %v904_v50, %v788_v49  ;;  %v416_v53 = vld [vmem:[%s1266_s5] sm:$0xf]  ;;  %v401_v35 = vld [vmem:[%s1262_s1 + $0x8] sm:$0xff] }
  0x15   :  { %858 = vmatpush.msk.msra.mxu2 %vm442_vm0, %v416_v53  ;;  %v402_v53 = vld [vmem:[%s1262_s1 + $0x10] sm:$0xff] }
  0x18   :  { %192 = vmatpush.bf16.msra.mxu1 %v809_v17  ;;  %160 = vmatpush.bf16.msra.mxu0 %v829_v36  ;;  %v400_v17 = vld [vmem:[%s1262_s1] sm:$0xff] }
  0x1c   :  { %193 = vmatpush.bf16.msra.mxu1 %v801_v20  ;;  %161 = vmatpush.bf16.msra.mxu0 %v821_v39 }
  0x20   :  { %194 = vmatpush.bf16.msra.mxu1 %v793_v23  ;;  %162 = vmatpush.bf16.msra.mxu0 %v813_v42 }
  0x23   :  { %195 = vmatmul.bf16.vlgmr.msra.gmra.mxu1 %v899_v24 }
  0x24   :  { %163 = vmatpush.bf16.msra.mxu0 %v805_v45 }
  0x28   :  { %164 = vmatpush.bf16.msra.mxu0 %v797_v48 }
  0x2c   :  { %165 = vmatpush.bf16.msra.mxu0 %v789_v51 }
  0x2f   :  { %166 = vmatmul.bf16.vlgmr.msra.gmra.mxu0 %v899_v24 }
  0x33   :  { %200 = vmatmul.bf16.gmra.mxu1 %v900_v25 }
  0x3f   :  { %171 = vmatmul.bf16.gmra.mxu0 %v900_v25 }
  0x43   :  { %205 = vmatmul.bf16.gmra.mxu1 %v1104_v32 }
  0x4f   :  { %176 = vmatmul.bf16.gmra.mxu0 %v1104_v32 }
  0x53   :  { %210 = vmatmul.bf16.gmra.mxu1 %v1110_v33 }
  0x5f   :  { %181 = vmatmul.bf16.gmra.mxu0 %v1110_v33 }
  0xa0   :  { %v196_v54 = vpop.f32.mrf.mxu1 }
  0xa1   :  { %v240_v55 = vadd.f32 %v1152_v52, %v196_v54 }
  0xa3   :  { %v850_v56 = vmul.f32 -1.442695, %v240_v55 }
  0xa5   :  { %931 = vpow2.f32 %v850_v56 }
  0xa8   :  { %v198_v57 = vpop.f32.mrf.mxu1 }
  0xa9   :  { %v241_v58 = vadd.f32 %v1152_v52, %v198_v57 }
  0xab   :  { %v932_v59 = vpop.eup %931  ;;  %v851_v60 = vmul.f32 -1.442695, %v241_v58 }
  0xac   :  { %v272_v61 = vadd.f32 1.0, %v932_v59 }
  0xad   :  { %933 = vpow2.f32 %v851_v60 }
  0xae   :  { %935 = vrcp.f32 %v272_v61  ;;  %v291_v7 = vand.u32 2147483648, %v272_v61  ;;  %v289_v10 = vand.u32 2147483647, %v272_v61  ;;  %vm285_vm2 = vweird.f32 %v272_v61 }
  0xb0   :  { %v201_v62 = vpop.f32.mrf.mxu1  ;;  %v292_v16 = vor.u32 1.1754944e-38, %v291_v7  ;;  %vm290_vm4 = vcmp.eq.f32.partialorder %v289_v10, 8.507059e+37 }
  0xb1   :  { %v242_v63 = vadd.f32 %v1152_v52, %v201_v62 }
  0xb3   :  { %v934_v0 = vpop.eup %933  ;;  %v852_v1 = vmul.f32 -1.442695, %v242_v63 }
  0xb4   :  { %v936_v2 = vpop.eup %935  ;;  %v273_v3 = vadd.f32 1.0, %v934_v0 }
  0xb5   :  { %v281_v4 = vmul.f32 %v936_v2, %v272_v61  ;;  %937 = vpow2.f32 %v852_v1  ;;  %vm286_vm1 = vweird.f32 %v936_v2 }
  0xb6   :  { %939 = vrcp.f32 %v273_v3  ;;  %vm287_vm3 = vmor %vm285_vm2, %vm286_vm1  ;;  %v306_v24 = vand.u32 2147483648, %v273_v3  ;;  %v304_v27 = vand.u32 2147483647, %v273_v3  ;;  %vm300_vm7 = vweird.f32 %v273_v3 }
  0xb7   :  { %v282_v5 = vsub.f32 1.0, %v281_v4 }
  0xb8   :  { %v203_v6 = vpop.f32.mrf.mxu1  ;;  %v307_v34 = vor.u32 1.1754944e-38, %v306_v24  ;;  %vm305_vm9 = vcmp.eq.f32.partialorder %v304_v27, 8.507059e+37 }
  0xb9   :  { %v243_v8 = vadd.f32 %v1152_v52, %v203_v6  ;;  %v283_v9 = vmul.f32 %v936_v2, %v282_v5  ;;  %v403_v5 = vld [vmem:[%s1262_s1 + $0x18] sm:$0xff] }
  0xbb   :  { %v938_v11 = vpop.eup %937  ;;  %v853_v12 = vmul.f32 -1.442695, %v243_v8  ;;  %v284_v13 = vadd.f32 %v936_v2, %v283_v9 }
  0xbc   :  { %v940_v14 = vpop.eup %939  ;;  %v274_v15 = vadd.f32 1.0, %v938_v11 }
  0xbd   :  { %v296_v18 = vmul.f32 %v940_v14, %v273_v3  ;;  %941 = vpow2.f32 %v853_v12  ;;  %v288_v19 = vsel %vm287_vm3, %v936_v2, %v284_v13  ;;  %vm301_vm6 = vweird.f32 %v940_v14 }
  0xbe   :  { %943 = vrcp.f32 %v274_v15  ;;  %v293_v20 = vsel %vm290_vm4, %v292_v16, %v288_v19  ;;  %vm302_vm8 = vmor %vm300_vm7, %vm301_vm6  ;;  %v321_v42 = vand.u32 2147483648, %v274_v15  ;;  %v319_v45 = vand.u32 2147483647, %v274_v15 }
  0xbf   :  { %v408_v21 = vmul.f32 %v400_v17, %v293_v20  ;;  %v297_v22 = vsub.f32 1.0, %v296_v18  ;;  %vm315_vm11 = vweird.f32 %v274_v15 }
  0xc0   :  { %v206_v23 = vpop.f32.mrf.mxu1  ;;  %v322_v51 = vor.u32 1.1754944e-38, %v321_v42  ;;  %vm320_vm13 = vcmp.eq.f32.partialorder %v319_v45, 8.507059e+37 }
  0xc1   :  { %v244_v25 = vadd.f32 %v1152_v52, %v206_v23  ;;  %859 = vmatmul.msk.f32.vlgmr.msra.gmra.mxu2 %vm417_vm5, %v408_v21  ;;  %v298_v26 = vmul.f32 %v940_v14, %v297_v22  ;;  %v404_v22 = vld [vmem:[%s1262_s1 + $0x20] sm:$0xff] }
  0xc3   :  { %v942_v28 = vpop.eup %941  ;;  %v854_v29 = vmul.f32 -1.442695, %v244_v25  ;;  %v299_v30 = vadd.f32 %v940_v14, %v298_v26 }
  0xc4   :  { %v944_v31 = vpop.eup %943  ;;  %v275_v32 = vadd.f32 1.0, %v942_v28 }
  0xc5   :  { %v311_v36 = vmul.f32 %v944_v31, %v274_v15  ;;  %945 = vpow2.f32 %v854_v29  ;;  %v303_v37 = vsel %vm302_vm8, %v940_v14, %v299_v30  ;;  %vm316_vm10 = vweird.f32 %v944_v31 }
  0xc6   :  { %947 = vrcp.f32 %v275_v32  ;;  %v308_v38 = vsel %vm305_vm9, %v307_v34, %v303_v37  ;;  %vm317_vm12 = vmor %vm315_vm11, %vm316_vm10  ;;  %v336_v60 = vand.u32 2147483648, %v275_v32  ;;  %v334_v62 = vand.u32 2147483647, %v275_v32 }
  0xc7   :  { %v409_v39 = vmul.f32 %v401_v35, %v308_v38  ;;  %v312_v40 = vsub.f32 1.0, %v311_v36  ;;  %vm330_vm15 = vweird.f32 %v275_v32  ;;  %v405_v36 = vld [vmem:[%s1262_s1 + $0x28] sm:$0xff] }
  0xc8   :  { %v208_v41 = vpop.f32.mrf.mxu1  ;;  %v337_v4 = vor.u32 1.1754944e-38, %v336_v60  ;;  %vm335_vm1 = vcmp.eq.f32.partialorder %v334_v62, 8.507059e+37  ;;  %v407_v60 = vld [vmem:[%s1262_s1 + $0x38] sm:$0xff] }
  0xc9   :  { %v245_v43 = vadd.f32 %v1152_v52, %v208_v41  ;;  %860 = vmatmul.msk.f32.gmra.mxu2 %vm417_vm5, %v409_v39  ;;  %v313_v44 = vmul.f32 %v944_v31, %v312_v40 }
  0xcb   :  { %v946_v46 = vpop.eup %945  ;;  %v855_v47 = vmul.f32 -1.442695, %v245_v43  ;;  %v314_v48 = vadd.f32 %v944_v31, %v313_v44 }
  0xcc   :  { %v948_v49 = vpop.eup %947  ;;  %v276_v50 = vadd.f32 1.0, %v946_v46 }
  0xcd   :  { %v326_v54 = vmul.f32 %v948_v49, %v275_v32  ;;  %949 = vpow2.f32 %v855_v47  ;;  %v318_v55 = vsel %vm317_vm12, %v944_v31, %v314_v48  ;;  %vm331_vm14 = vweird.f32 %v948_v49  ;;  %v406_v48 = vld [vmem:[%s1262_s1 + $0x30] sm:$0xff] }
  0xce   :  { %951 = vrcp.f32 %v276_v50  ;;  %v323_v56 = vsel %vm320_vm13, %v322_v51, %v318_v55  ;;  %vm332_vm0 = vmor %vm330_vm15, %vm331_vm14  ;;  %v351_v12 = vand.u32 2147483648, %v276_v50  ;;  %v349_v15 = vand.u32 2147483647, %v276_v50 }
  0xcf   :  { %v410_v57 = vmul.f32 %v402_v53, %v323_v56  ;;  %v327_v58 = vsub.f32 1.0, %v326_v54  ;;  %vm345_vm3 = vweird.f32 %v276_v50 }
  0xd0   :  { %v211_v59 = vpop.f32.mrf.mxu1  ;;  %v352_v21 = vor.u32 1.1754944e-38, %v351_v12  ;;  %vm350_vm6 = vcmp.eq.f32.partialorder %v349_v15, 8.507059e+37  ;;  %v926_v12 = vld [vmem:[%s1267_s6 + $0x38] sm:$0xff] }
  0xd1   :  { %v246_v33 = vadd.f32 %v1152_v52, %v211_v59  ;;  %861 = vmatmul.msk.f32.gmra.mxu2 %vm417_vm5, %v410_v57  ;;  %v328_v61 = vmul.f32 %v948_v49, %v327_v58  ;;  %739 = vmatpush.bf16.msra.mxu3 %v926_v12 }
  0xd3   :  { %v950_v63 = vpop.eup %949  ;;  %v856_v0 = vmul.f32 -1.442695, %v246_v33  ;;  %v329_v1 = vadd.f32 %v948_v49, %v328_v61 }
  0xd4   :  { %v952_v2 = vpop.eup %951  ;;  %v277_v3 = vadd.f32 1.0, %v950_v63  ;;  %v167_v63 = vpop.f32.mrf.mxu0 }
  0xd5   :  { %v341_v6 = vmul.f32 %v952_v2, %v276_v50  ;;  %953 = vpow2.f32 %v856_v0  ;;  %v333_v7 = vsel %vm332_vm0, %v948_v49, %v329_v1  ;;  %vm346_vm2 = vweird.f32 %v952_v2 }
  0xd6   :  { %955 = vrcp.f32 %v277_v3  ;;  %v338_v8 = vsel %vm335_vm1, %v337_v4, %v333_v7  ;;  %vm347_vm4 = vmor %vm345_vm3, %vm346_vm2  ;;  %v366_v27 = vand.u32 2147483648, %v277_v3  ;;  %v364_v29 = vand.u32 2147483647, %v277_v3 }
  0xd7   :  { %v411_v9 = vmul.f32 %v403_v5, %v338_v8  ;;  %v342_v10 = vsub.f32 1.0, %v341_v6  ;;  %vm360_vm8 = vweird.f32 %v277_v3  ;;  %v1202_v5 = vld [vmem:[%s1265_s4] ss:$0 sm:$0xff]  ;;  %vm672_vm3 = vcmask 1042434  }
  0xd8   :  { %v213_v11 = vpop.f32.mrf.mxu1  ;;  %v367_v35 = vor.u32 1.1754944e-38, %v366_v27  ;;  %vm365_vm10 = vcmp.eq.f32.partialorder %v364_v29, 8.507059e+37  ;;  %v220_v6 = vadd.f32 %v1202_v5, %v167_v63 }
  0xd9   :  { %v247_v13 = vadd.f32 %v1152_v52, %v213_v11  ;;  %862 = vmatmul.msk.f32.gmra.mxu2 %vm417_vm5, %v411_v9  ;;  %v343_v14 = vmul.f32 %v952_v2, %v342_v10 }
  0xda   :  { %v228_v10 = vmax.f32 %v220_v6, 0.0 }
  0xdb   :  { %v954_v16 = vpop.eup %953  ;;  %v857_v17 = vmul.f32 -1.442695, %v247_v13  ;;  %v344_v18 = vadd.f32 %v952_v2, %v343_v14 }
  0xdc   :  { %v956_v19 = vpop.eup %955  ;;  %v278_v20 = vadd.f32 1.0, %v954_v16  ;;  %v169_v0 = vpop.f32.mrf.mxu0 }
  0xdd   :  { %v356_v23 = vmul.f32 %v956_v19, %v277_v3  ;;  %957 = vpow2.f32 %v857_v17  ;;  %v348_v52 = vsel %vm347_vm4, %v952_v2, %v344_v18  ;;  %vm361_vm7 = vweird.f32 %v956_v19 }
  0xde   :  { %959 = vrcp.f32 %v278_v20  ;;  %v353_v24 = vsel %vm350_vm6, %v352_v21, %v348_v52  ;;  %vm362_vm9 = vmor %vm360_vm8, %vm361_vm7  ;;  %v381_v42 = vand.u32 2147483648, %v278_v20  ;;  %v379_v44 = vand.u32 2147483647, %v278_v20 }
  0xdf   :  { %v412_v25 = vmul.f32 %v404_v22, %v353_v24  ;;  %v357_v26 = vsub.f32 1.0, %v356_v23  ;;  %vm375_vm12 = vweird.f32 %v278_v20  ;;  %v221_v8 = vadd.f32 %v1202_v5, %v169_v0 }
  0xe0   :  { %v382_v47 = vor.u32 1.1754944e-38, %v381_v42  ;;  %vm380_vm14 = vcmp.eq.f32.partialorder %v379_v44, 8.507059e+37  ;;  %v922_v42 = vld [vmem:[%s1267_s6 + $0x18] sm:$0xff]  ;;  %vm675_vm4 = vcmask 1043459   ;;  %vm678_vm6 = vcmask 1044484  }
  0xe1   :  { %863 = vmatmul.msk.f32.gmra.mxu2 %vm417_vm5, %v412_v25  ;;  %v358_v28 = vmul.f32 %v956_v19, %v357_v26  ;;  %v229_v13 = vmax.f32 %v221_v8, 0.0  ;;  %v924_v25 = vld [vmem:[%s1267_s6 + $0x28] sm:$0xff]  ;;  %vm681_vm7 = vcmask 1045509   ;;  %vm684_vm8 = vcmask 1046534  }
  0xe3   :  { %v958_v30 = vpop.eup %957  ;;  %v359_v31 = vadd.f32 %v956_v19, %v358_v28 }
  0xe4   :  { %v960_v32 = vpop.eup %959  ;;  %v279_v34 = vadd.f32 1.0, %v958_v30  ;;  %v172_v1 = vpop.f32.mrf.mxu0 }
  0xe5   :  { %v371_v37 = vmul.f32 %v960_v32, %v278_v20  ;;  %v363_v38 = vsel %vm362_vm9, %v956_v19, %v359_v31  ;;  %vm376_vm11 = vweird.f32 %v960_v32  ;;  %v222_v11 = vadd.f32 %v1202_v5, %v172_v1  ;;  %v925_v19 = vld [vmem:[%s1267_s6 + $0x30] sm:$0xff] }
  0xe6   :  { %961 = vrcp.f32 %v279_v34  ;;  %v368_v39 = vsel %vm365_vm10, %v367_v35, %v363_v38  ;;  %vm377_vm13 = vmor %vm375_vm12, %vm376_vm11  ;;  %v396_v55 = vand.u32 2147483648, %v279_v34  ;;  %v394_v57 = vand.u32 2147483647, %v279_v34  ;;  %740 = vmatpush.bf16.msra.mxu3 %v925_v19 }
  0xe7   :  { %v413_v40 = vmul.f32 %v405_v36, %v368_v39  ;;  %v372_v41 = vsub.f32 1.0, %v371_v37  ;;  %vm390_vm0 = vweird.f32 %v279_v34  ;;  %v230_v17 = vmax.f32 %v222_v11, 0.0 }
  0xe8   :  { %v397_v59 = vor.u32 1.1754944e-38, %v396_v55  ;;  %vm395_vm2 = vcmp.eq.f32.partialorder %v394_v57, 8.507059e+37  ;;  %vm687_vm9 = vcmask 1047559   ;;  %vm752_vm10 = vcmask 523264  }
  0xe9   :  { %864 = vmatmul.msk.f32.gmra.mxu2 %vm417_vm5, %v413_v40  ;;  %v373_v43 = vmul.f32 %v960_v32, %v372_v41 }
  0xea   :  { %741 = vmatpush.bf16.msra.mxu3 %v924_v25 }
  0xeb   :  { %v374_v45 = vadd.f32 %v960_v32, %v373_v43 }
  0xec   :  { %v962_v46 = vpop.eup %961  ;;  %v174_v4 = vpop.f32.mrf.mxu0 }
  0xed   :  { %v386_v49 = vmul.f32 %v962_v46, %v279_v34  ;;  %v378_v50 = vsel %vm377_vm13, %v960_v32, %v374_v45  ;;  %vm391_vm15 = vweird.f32 %v962_v46  ;;  %v223_v15 = vadd.f32 %v1202_v5, %v174_v4  ;;  %v923_v32 = vld [vmem:[%s1267_s6 + $0x20] sm:$0xff] }
  0xee   :  { %v383_v51 = vsel %vm380_vm14, %v382_v47, %v378_v50  ;;  %vm392_vm1 = vmor %vm390_vm0, %vm391_vm15  ;;  %742 = vmatpush.bf16.msra.mxu3 %v923_v32  ;;  %v921_v47 = vld [vmem:[%s1267_s6 + $0x10] sm:$0xff] }
  0xef   :  { %v414_v53 = vmul.f32 %v406_v48, %v383_v51  ;;  %v387_v54 = vsub.f32 1.0, %v386_v49  ;;  %v231_v22 = vmax.f32 %v223_v15, 0.0  ;;  %v919_v15 = vld [vmem:[%s1267_s6] sm:$0xff] }
  0xf1   :  { %865 = vmatmul.msk.f32.gmra.mxu2 %vm417_vm5, %v414_v53  ;;  %v388_v56 = vmul.f32 %v962_v46, %v387_v54 }
  0xf2   :  { %743 = vmatpush.bf16.msra.mxu3 %v922_v42 }
  0xf3   :  { %v389_v58 = vadd.f32 %v962_v46, %v388_v56 }
  0xf4   :  { %v177_v9 = vpop.f32.mrf.mxu0 }
  0xf5   :  { %v393_v33 = vsel %vm392_vm1, %v962_v46, %v389_v58  ;;  %v224_v20 = vadd.f32 %v1202_v5, %v177_v9 }
  0xf6   :  { %v398_v61 = vsel %vm395_vm2, %v397_v59, %v393_v33  ;;  %744 = vmatpush.bf16.msra.mxu3 %v921_v47  ;;  %v920_v33 = vld [vmem:[%s1267_s6 + $0x8] sm:$0xff] }
  0xf7   :  { %v415_v62 = vmul.f32 %v407_v60, %v398_v61  ;;  %v232_v26 = vmax.f32 %v224_v20, 0.0 }
  0xf9   :  { %866 = vmatmul.msk.f32.gmra.mxu2 %vm417_vm5, %v415_v62  ;;  %v1237_v62 = vld [vmem:[%s1263_s2] sm:$0xff]  ;;  %vm669_vm5 = vcmask 1041409  }
  0xfa   :  { %v594_v12 = vrot.slane %v1237_v62, 2  ;;  %745 = vmatpush.bf16.msra.mxu3 %v920_v33  ;;  %v595_v19 = vrot.slane %v1237_v62, 3 }
  0xfc   :  { %v179_v24 = vpop.f32.mrf.mxu0 }
  0xfd   :  { %v225_v38 = vadd.f32 %v1202_v5, %v179_v24 }
  0xfe   :  { %746 = vmatpush.bf16.msra.mxu3 %v919_v15 }
  0xff   :  { %v233_v50 = vmax.f32 %v225_v38, 0.0 }
 0x104   :  { %v182_v46 = vpop.f32.mrf.mxu0 }
 0x105   :  { %v226_v57 = vadd.f32 %v1202_v5, %v182_v46 }
 0x107   :  { %v234_v9 = vmax.f32 %v226_v57, 0.0 }
 0x144   :  { %v463_v2 = vpop.f32.mrf.mxu2 }
 0x145   :  { %v487_v16 = vmul.f32 %v463_v2, %v228_v10 }
 0x147   :  { %v495_v23 = vrot.slane %v487_v16, 4 }
 0x149   :  { %v544_v29 = vadd.f32 %v495_v23, %v487_v16  ;;  %v496_v36 = vmax.f32 %v487_v16, %v495_v23 }
 0x14b   :  { %v545_v40 = vrot.slane %v544_v29, 2  ;;  %v497_v48 = vrot.slane %v496_v36, 2 }
 0x14c   :  { %v466_v3 = vpop.f32.mrf.mxu2 }
 0x14d   :  { %v488_v14 = vmul.f32 %v466_v3, %v229_v13  ;;  %v546_v51 = vadd.f32 %v545_v40, %v544_v29  ;;  %v1232_v61 = vmax.f32 %v496_v36, %v497_v48  ;;  %v593_v3 = vrot.slane %v1237_v62, 1 }
 0x14f   :  { %v501_v21 = vrot.slane %v488_v14, 4  ;;  %v547_v2 = vrot.slane %v546_v51, 1  ;;  %v499_v16 = vrot.slane %v1232_v61, 1 }
 0x151   :  { %v550_v28 = vadd.f32 %v501_v21, %v488_v14  ;;  %v502_v43 = vmax.f32 %v488_v14, %v501_v21  ;;  %v548_v25 = vadd.f32 %v547_v2, %v546_v51 }
 0x153   :  { %v551_v37 = vrot.slane %v550_v28, 2  ;;  %v503_v55 = vrot.slane %v502_v43, 2 }
 0x154   :  { %v469_v7 = vpop.f32.mrf.mxu2 }
 0x155   :  { %v489_v52 = vmul.f32 %v469_v7, %v230_v17  ;;  %v552_v49 = vadd.f32 %v551_v37, %v550_v28  ;;  %v504_v7 = vmax.f32 %v502_v43, %v503_v55 }
 0x157   :  { %v507_v30 = vrot.slane %v489_v52, 4  ;;  %v553_v63 = vrot.slane %v552_v49, 1 }
 0x159   :  { %v556_v41 = vadd.f32 %v507_v30, %v489_v52  ;;  %v508_v59 = vmax.f32 %v489_v52, %v507_v30  ;;  %v554_v17 = vadd.f32 %v553_v63, %v552_v49  ;;  %v184_v52 = vpop.f32.mrf.mxu0  ;;  %v597_v49 = vrot.slane %v1237_v62, 5 }
 0x15a   :  { %v227_v36 = vadd.f32 %v1202_v5, %v184_v52 }
 0x15b   :  { %v557_v53 = vrot.slane %v556_v41, 2  ;;  %v509_v11 = vrot.slane %v508_v59, 2 }
 0x15c   :  { %v472_v18 = vpop.f32.mrf.mxu2  ;;  %v235_v51 = vmax.f32 %v227_v36, 0.0 }
 0x15d   :  { %v490_v27 = vmul.f32 %v472_v18, %v231_v22  ;;  %v558_v4 = vadd.f32 %v557_v53, %v556_v41  ;;  %v510_v29 = vmax.f32 %v508_v59, %v509_v11 }
 0x15f   :  { %v513_v34 = vrot.slane %v490_v27, 4  ;;  %v559_v20 = vrot.slane %v558_v4, 1  ;;  %v511_v46 = vrot.slane %v510_v29, 1 }
 0x161   :  { %v562_v44 = vadd.f32 %v513_v34, %v490_v27  ;;  %v514_v0 = vmax.f32 %v490_v27, %v513_v34  ;;  %v609_v34 = vmul.f32 %v593_v3, %v554_v17  ;;  %v560_v38 = vadd.f32 %v559_v20, %v558_v4 }
 0x162   :  { %v598_v3 = vrot.slane %v1237_v62, 6 }
 0x163   :  { %v563_v56 = vrot.slane %v562_v44, 2  ;;  %v515_v18 = vrot.slane %v514_v0, 2  ;;  %v610_v5 = vmul.f32 %v594_v12, %v560_v38 }
 0x164   :  { %v475_v31 = vpop.f32.mrf.mxu2 }
 0x165   :  { %v491_v35 = vmul.f32 %v475_v31, %v232_v26  ;;  %v564_v8 = vadd.f32 %v563_v56, %v562_v44  ;;  %v505_v26 = vrot.slane %v504_v7, 1  ;;  %v596_v31 = vrot.slane %v1237_v62, 4 }
 0x167   :  { %v519_v39 = vrot.slane %v491_v35, 4  ;;  %v565_v27 = vrot.slane %v564_v8, 1  ;;  %v506_v42 = vmax.f32 %v504_v7, %v505_v26 }
 0x169   :  { %v568_v45 = vadd.f32 %v519_v39, %v491_v35  ;;  %v520_v6 = vmax.f32 %v491_v35, %v519_v39  ;;  %v516_v35 = vmax.f32 %v514_v0, %v515_v18  ;;  %v566_v43 = vadd.f32 %v565_v27, %v564_v8 }
 0x16a   :  { %v617_v55 = vadd.f32 %v609_v34, %v506_v42  ;;  %v512_v0 = vmax.f32 %v510_v29, %v511_v46  ;;  %v500_v18 = vmax.f32 %v1232_v61, %v499_v16  ;;  %v599_v61 = vrot.slane %v1237_v62, 7 }
 0x16b   :  { %v569_v60 = vrot.slane %v568_v45, 2  ;;  %v521_v21 = vrot.slane %v520_v6, 2  ;;  %v611_v59 = vmul.f32 %v595_v19, %v566_v43 }
 0x16c   :  { %v478_v54 = vpop.f32.mrf.mxu2  ;;  %v625_v19 = vpack.c.bf16 %v617_v55, %v617_v55 }
 0x16d   :  { %v492_v58 = vmul.f32 %v478_v54, %v233_v50  ;;  %v570_v13 = vadd.f32 %v569_v60, %v568_v45  ;;  %v522_v39 = vmax.f32 %v520_v6, %v521_v21  ;;  %v517_v50 = vrot.slane %v516_v35, 1 }
 0x16f   :  { %v525_v1 = vrot.slane %v492_v58, 4  ;;  %v571_v30 = vrot.slane %v570_v13, 1  ;;  %v523_v56 = vrot.slane %v522_v39, 1  ;;  %v518_v4 = vmax.f32 %v516_v35, %v517_v50 }
 0x171   :  { %v526_v10 = vmax.f32 %v492_v58, %v525_v1  ;;  %v574_v14 = vadd.f32 %v525_v1, %v492_v58  ;;  %v572_v47 = vadd.f32 %v571_v30, %v570_v13  ;;  %v524_v11 = vmax.f32 %v522_v39, %v523_v56 }
 0x172   :  { %v619_v13 = vadd.f32 %v611_v59, %v518_v4 }
 0x173   :  { %v527_v22 = vrot.slane %v526_v10, 2  ;;  %v575_v23 = vrot.slane %v574_v14, 2  ;;  %v612_v1 = vmul.f32 %v596_v31, %v572_v47  ;;  %v661_v31 = vunpack.c.l.b16 %v625_v19 }
 0x174   :  { %v481_v24 = vpop.f32.mrf.mxu2  ;;  %v627_v27 = vpack.c.bf16 %v619_v13, %v619_v13 }
 0x175   :  { %v493_v28 = vmul.f32 %v481_v24, %v234_v9  ;;  %v576_v32 = vadd.f32 %v575_v23, %v574_v14  ;;  %v528_v40 = vmax.f32 %v526_v10, %v527_v22  ;;  %v608_v9 = vmul.f32 %v1237_v62, %v548_v25 }
 0x176   :  { %v618_v10 = vadd.f32 %v610_v5, %v512_v0  ;;  %v620_v20 = vadd.f32 %v612_v1, %v524_v11  ;;  %v663_v39 = vunpack.c.l.b16 %v627_v27  ;;  %v668_v42 = vrot.slane %v661_v31, 7  ;;  %v930_v1 = vld [vmem:[%s1268_s7] ss:$0 sm:$0xff] }
 0x177   :  { %v531_v37 = vrot.slane %v493_v28, 4  ;;  %v577_v41 = vrot.slane %v576_v32, 1  ;;  %v529_v57 = vrot.slane %v528_v40, 1  ;;  %v616_v26 = vadd.f32 %v608_v9, %v500_v18 }
 0x178   :  { %v626_v25 = vpack.c.bf16 %v618_v10, %v618_v10 }
 0x179   :  { %v532_v44 = vmax.f32 %v493_v28, %v531_v37  ;;  %v580_v45 = vadd.f32 %v531_v37, %v493_v28  ;;  %v578_v48 = vadd.f32 %v577_v41, %v576_v32  ;;  %v530_v12 = vmax.f32 %v528_v40, %v529_v57 }
 0x17a   :  { %v628_v32 = vpack.c.bf16 %v620_v20, %v620_v20  ;;  %v662_v16 = vunpack.c.l.b16 %v626_v25  ;;  %v624_v38 = vpack.c.bf16 %v616_v26, %v616_v26 }
 0x17b   :  { %v533_v53 = vrot.slane %v532_v44, 2  ;;  %v581_v54 = vrot.slane %v580_v45, 2  ;;  %v613_v2 = vmul.f32 %v597_v49, %v578_v48  ;;  %v674_v49 = vrot.slane %v663_v39, 5 }
 0x17c   :  { %v484_v58 = vpop.f32.mrf.mxu2  ;;  %v664_v41 = vunpack.c.l.b16 %v628_v32  ;;  %v671_v46 = vrot.slane %v662_v16, 6  ;;  %v660_v48 = vunpack.c.l.b16 %v624_v38 }
 0x17d   :  { %v534_v60 = vmax.f32 %v532_v44, %v533_v53  ;;  %v582_v33 = vadd.f32 %v581_v54, %v580_v45  ;;  %v494_v63 = vmul.f32 %v484_v58, %v235_v51  ;;  %v621_v21 = vadd.f32 %v613_v2, %v530_v12 }
 0x17e   :  { %v677_v51 = vrot.slane %v664_v41, 4  ;;  %v670_v53 = vsel %vm669_vm5, %v668_v42, %v660_v48 }
 0x17f   :  { %v535_v6 = vrot.slane %v534_v60, 1  ;;  %v583_v7 = vrot.slane %v582_v33, 1  ;;  %v537_v8 = vrot.slane %v494_v63, 4  ;;  %v629_v34 = vpack.c.bf16 %v621_v21, %v621_v21 }
 0x180   :  { %v673_v55 = vsel %vm672_vm3, %v671_v46, %v670_v53 }
 0x181   :  { %v584_v14 = vadd.f32 %v583_v7, %v582_v33  ;;  %v538_v15 = vmax.f32 %v494_v63, %v537_v8  ;;  %v586_v17 = vadd.f32 %v537_v8, %v494_v63  ;;  %v536_v22 = vmax.f32 %v534_v60, %v535_v6 }
 0x182   :  { %v665_v45 = vunpack.c.l.b16 %v629_v34  ;;  %v676_v57 = vsel %vm675_vm4, %v674_v49, %v673_v55 }
 0x183   :  { %v614_v23 = vmul.f32 %v598_v3, %v584_v14  ;;  %v539_v52 = vrot.slane %v538_v15, 2  ;;  %v587_v24 = vrot.slane %v586_v17, 2  ;;  %v679_v58 = vsel %vm678_vm6, %v677_v51, %v676_v57 }
 0x184   :  { %v680_v54 = vrot.slane %v665_v45, 3 }
 0x185   :  { %v540_v28 = vmax.f32 %v538_v15, %v539_v52  ;;  %v588_v29 = vadd.f32 %v587_v24, %v586_v17  ;;  %v622_v30 = vadd.f32 %v614_v23, %v536_v22 }
 0x186   :  { %v682_v59 = vsel %vm681_vm7, %v680_v54, %v679_v58 }
 0x187   :  { %v541_v35 = vrot.slane %v540_v28, 1  ;;  %v589_v36 = vrot.slane %v588_v29, 1  ;;  %v630_v37 = vpack.c.bf16 %v622_v30, %v622_v30 }
 0x189   :  { %v590_v40 = vadd.f32 %v589_v36, %v588_v29  ;;  %v542_v43 = vmax.f32 %v540_v28, %v541_v35  ;;  %v666_v47 = vunpack.c.l.b16 %v630_v37 }
 0x18b   :  { %v615_v44 = vmul.f32 %v599_v61, %v590_v40  ;;  %v683_v5 = vrot.slane %v666_v47, 2 }
 0x18d   :  { %v623_v50 = vadd.f32 %v615_v44, %v542_v43  ;;  %v685_v33 = vsel %vm684_vm8, %v683_v5, %v682_v59 }
 0x18f   :  { %v631_v62 = vpack.c.bf16 %v623_v50, %v623_v50 }
 0x191   :  { %v667_v56 = vunpack.c.l.b16 %v631_v62 }
 0x193   :  { %v686_v60 = vrot.slane %v667_v56, 1 }
 0x195   :  { %v688_v63 = vsel %vm687_vm9, %v686_v60, %v685_v33 }
 0x196   :  { %v689_v0 = vpack.c.b16 %v688_v63, %v688_v63 }
 0x198   :  { %747 = vmatmul.bf16.vlgmr.msra.gmra.mxu3 %v689_v0 }
 0x21b   :  { %v748_v2 = vpop.f32.mrf.mxu3 }
 0x21c   :  { %v749_v3 = vadd.f32 %v930_v1, %v748_v2 }
 0x21e   :  { %753 = vst.msk [vmem:[#allocation2] sm:$0xff] %vm752_vm10, %v749_v3 }
 0x21f   :  { %764 = dma.vmem_to_hbm [thread:$0]  %s760_s21, 128, %s762_s24, [#allocation3]  }
 0x223   :  { %v750_v4 = vpop.f32.mrf.mxu3 }
 0x224   :  { %987 = dma.done.wait [#allocation3], 128  }
 0x225   :  { %988 = vsyncadd [#allocation3], 4294967168 }
 0x226   :  { %769 = vsyncpa [#allocation3], 1 }

</bundles_post_ra>
